<compile_context>
chip_gen: v5e
topology: v5e:2x2
jax: 0.10.0
libtpu: 0.0.40
codegen_flags: <defaults>
</compile_context>

<pallas_src>
import functools
import math

import jax
import jax.numpy as jnp
from jax.experimental import pallas as pl
from jax.experimental.pallas import tpu as pltpu

EPS = 1e-5  # torch.nn.GroupNorm default


def _conv_gn_gelu_kernel(patches_ref, w_ref, gamma_ref, beta_ref, o_ref,
                         sum_ref, sq_ref, *, n_t, t_tile, t_valid,
                         slab_resident):
    # patches_ref: (1, KC, T_pad) [resident slab] or (1, KC, t_tile) [fallback]
    # w_ref: (c_tile, KC)   gamma_ref/beta_ref: (c_tile, 1)
    # o_ref: (1, c_tile, t_tile)
    # sum_ref/sq_ref: (c_tile, 1) f32 scratch; after t == n_t they hold the
    # folded GroupNorm (scale, shift) instead of the raw statistics.
    t = pl.program_id(2)

    @pl.when(t == 0)
    def _():
        sum_ref[...] = jnp.zeros_like(sum_ref)
        sq_ref[...] = jnp.zeros_like(sq_ref)

    # --- Conv1d tile as matmul over im2col patches (contraction = C_in*K) ---
    if slab_resident:
        # Whole per-batch patch slab lives in VMEM; slice the lane-aligned
        # t-tile locally (no per-step HBM re-read of the patches).
        t_idx = jnp.where(t < n_t, t, t - n_t)
        start = pl.multiple_of(t_idx * t_tile, 128)
        p = patches_ref[0, :, pl.ds(start, t_tile)].astype(jnp.float32)
    else:
        p = patches_ref[0].astype(jnp.float32)                    # (KC, t_tile)
    w = w_ref[...].astype(jnp.float32)                            # (c_tile, KC)
    y = jnp.dot(w, p, preferred_element_type=jnp.float32)         # (c_tile, t_tile)
    # NOTE: conv bias intentionally omitted — GroupNorm's mean subtraction
    # cancels any per-channel constant, so adding it is wasted work.

    @pl.when(t < n_t)
    def _():
        # Phase 1: streaming per-channel sum / sum-of-squares via XLU row
        # reductions (MXU and EUP are idle here).  Zero-padded columns add 0.
        # NOTE: E[y^2] - mean^2 in f32 can lose precision if |mean| >> std over
        # very long sequences; validated against the exact reference below.
        sum_ref[...] += jnp.sum(y, axis=-1, keepdims=True)
        sq_ref[...] += jnp.sum(y * y, axis=-1, keepdims=True)

    @pl.when(t == n_t)
    def _():
        # Fold GroupNorm into one per-channel (scale, shift) pair, computed
        # exactly once; reuse the stats scratch to hold it for phase 2.
        inv_n = jnp.float32(1.0 / float(t_valid))
        mean = sum_ref[...] * inv_n
        var = sq_ref[...] * inv_n - mean * mean
        scale = gamma_ref[...] * jax.lax.rsqrt(var + EPS)         # (c_tile, 1)
        shift = beta_ref[...] - mean * scale
        sum_ref[...] = scale
        sq_ref[...] = shift

    @pl.when(t >= n_t)
    def _():
        # Phase 2: fused affine + exact-erf GELU (matches HF "gelu").
        # NOTE: erf is a VALU-bound polynomial (the phase-2 limiter); if an
        # approximate GELU is acceptable, z * jax.nn.sigmoid(1.702 * z) rides
        # the otherwise-idle EUP slot instead.
        z = y * sum_ref[...] + sq_ref[...]
        out = 0.5 * z * (1.0 + jax.lax.erf(z * (1.0 / math.sqrt(2.0))))
        o_ref[0] = out.astype(o_ref.dtype)


def _round_up(a, b):
    return -(-a // b) * b


def hubert_group_norm_conv_layer(x, weight, bias, gamma, beta, *, stride,
                                 c_tile=128, t_tile_max=8192):
    """x: (B, C_in, T). weight: (C_out, C_in, K). Returns (B, C_out, T_out).

    `bias` is accepted for API parity with nn.Conv1d but is unused: GroupNorm
    removes any per-channel constant, so the result is identical without it.
    """
    del bias  # mathematically cancelled by GroupNorm (mean subtraction)

    B, C_in, T = x.shape
    C_out, C_in_w, K = weight.shape
    assert C_in_w == C_in
    T_out = (T - K) // stride + 1
    KC = C_in * K

    # --- tile sizing (lane-dense T tiles, sublane-aligned C tiles) ----------
    t_tile_max = max(128, (t_tile_max // 128) * 128)
    t_tile = min(t_tile_max, _round_up(T_out, 128))          # multiple of 128
    T_pad = _round_up(T_out, t_tile)
    n_t = T_pad // t_tile

    c_tile = min(c_tile, C_out)
    if c_tile <= 0 or C_out % c_tile != 0 or (c_tile % 8 != 0 and c_tile != C_out):
        c_tile = C_out                                        # full dim always legal
    # v7x megacore: if only one (b, c) "parallel" slice exists, shrink c_tile
    # so both TensorCores get work.
    if B * (C_out // c_tile) < 2:
        for cand in range(8 * (c_tile // 16), 0, -8):
            if C_out % cand == 0:
                c_tile = cand
                break
    n_c = C_out // c_tile

    # --- im2col via K strided slices (no XLA gather) ------------------------
    # TODO(synk): move the im2col into the kernel with strided pl.ds reads on a
    # raw x window (memory_space=pl.ANY) to avoid the K/stride-replicated HBM
    # array entirely (minor at C_in = 1, K = 10).
    span = (T_out - 1) * stride + 1
    cols = [x[:, :, k:k + span:stride] for k in range(K)]     # K cheap lax.slices
    patches = jnp.stack(cols, axis=2).reshape(B, KC, T_out)   # (C_in, K) flattening
    if T_pad != T_out:
        patches = jnp.pad(patches, ((0, 0), (0, 0), (0, T_pad - T_out)))

    w2d = weight.reshape(C_out, KC)
    g2d = gamma.reshape(C_out, 1).astype(jnp.float32)
    be2d = beta.reshape(C_out, 1).astype(jnp.float32)

    # Keep the whole per-batch patch slab resident in VMEM when small (~1.3 MiB
    # at T_out ~ 32k for this layer) so it is DMA'd once per batch instead of
    # 2 * n_c times; otherwise fall back to per-tile patch blocks.
    slab_resident = KC * T_pad * 4 <= (8 << 20)
    if slab_resident:
        patch_spec = pl.BlockSpec((1, KC, T_pad), lambda b, c, t: (b, 0, 0))
        patch_block_bytes = KC * T_pad * 4
    else:
        patch_spec = pl.BlockSpec((1, KC, t_tile), lambda b, c, t: (b, 0, t % n_t))
        patch_block_bytes = KC * t_tile * 4

    # Scoped-VMEM request: actual (double-buffered) need + margin, capped well
    # below v7x's 64 MiB physical per-TC VMEM.
    est = (2 * patch_block_bytes            # patch window
           + 2 * c_tile * KC * 4            # weights
           + 4 * c_tile * 4                 # gamma / beta
           + 2 * c_tile * t_tile * 4        # output tile
           + 2 * c_tile * 4)                # stats scratch
    vmem_limit = int(min(48 << 20, max(16 << 20, 2 * est + (4 << 20))))

    kernel = functools.partial(_conv_gn_gelu_kernel, n_t=n_t, t_tile=t_tile,
                               t_valid=T_out, slab_resident=slab_resident)

    return pl.pallas_call(
        kernel,
        # Output is declared at the true T_out: the ragged last t-tile is
        # masked on writeback, so no trailing slice copy of a padded array.
        out_shape=jax.ShapeDtypeStruct((B, C_out, T_out), x.dtype),
        grid_spec=pltpu.PrefetchScalarGridSpec(
            num_scalar_prefetch=0,
            grid=(B, n_c, 2 * n_t),
            in_specs=[
                patch_spec,
                pl.BlockSpec((c_tile, KC), lambda b, c, t: (c, 0)),
                pl.BlockSpec((c_tile, 1), lambda b, c, t: (c, 0)),
                pl.BlockSpec((c_tile, 1), lambda b, c, t: (c, 0)),
            ],
            # Phase 1 pins the output block index at tile 0 (never written, so
            # nothing is flushed); phase 2 writes tiles 0..n_t-1 exactly once,
            # fully overwriting tile 0 before the index advances.  This relies
            # on Pallas only writing back an output block when its block index
            # changes (current revisit semantics).
            out_specs=pl.BlockSpec(
                (1, c_tile, t_tile),
                lambda b, c, t: (b, c, jnp.where(t < n_t, 0, t - n_t))),
            scratch_shapes=[
                pltpu.VMEM((c_tile, 1), jnp.float32),   # sum   -> scale
                pltpu.VMEM((c_tile, 1), jnp.float32),   # sumsq -> shift
            ],
        ),
        compiler_params=pltpu.CompilerParams(
            dimension_semantics=("parallel", "parallel", "arbitrary"),
            vmem_limit_bytes=vmem_limit,
        ),
    )(patches, w2d, g2d, be2d)


def _reference(x, weight, bias, gamma, beta, *, stride):
    """Pure-JAX reference (matches the PyTorch module, including conv bias)."""
    y = jax.lax.conv_general_dilated(
        x, weight, window_strides=(stride,), padding="VALID",
        dimension_numbers=("NCH", "OIH", "NCH"))
    y = y + bias[None, :, None]
    mean = jnp.mean(y, axis=2, keepdims=True)
    var = jnp.mean((y - mean) ** 2, axis=2, keepdims=True)
    y = (y - mean) * jax.lax.rsqrt(var + EPS)
    y = y * gamma[None, :, None] + beta[None, :, None]
    return 0.5 * y * (1.0 + jax.lax.erf(y / math.sqrt(2.0)))


if __name__ == "__main__":
    # Layer 0 of the HuBERT feature extractor: in_conv_dim = 1.
    # Small shapes chosen so channel tiling (2 tiles), the two-phase T tiling
    # (n_t = 2), the resident patch slab, and the ragged last output tile
    # (T_out = 200, t_tile = 128) are all exercised.
    B, C_in = 2, 1
    C_out, K, stride = 32, 10, 5          # conv_dim[0], conv_kernel[0], conv_stride[0]
    T_out_target = 200
    T = K + stride * (T_out_target - 1)   # -> T_out = 200

    key = jax.random.PRNGKey(0)
    kx, kw, kb, kg, kbeta = jax.random.split(key, 5)

    x = jax.random.normal(kx, (B, C_in, T), dtype=jnp.float32)
    fan_in = C_in * K
    bound = 1.0 / math.sqrt(fan_in)
    weight = jax.random.uniform(kw, (C_out, C_in, K), jnp.float32, -bound, bound)
    bias = jax.random.uniform(kb, (C_out,), jnp.float32, -bound, bound)
    gamma = 1.0 + 0.1 * jax.random.normal(kg, (C_out,), jnp.float32)
    beta = 0.1 * jax.random.normal(kbeta, (C_out,), jnp.float32)

    out = hubert_group_norm_conv_layer(
        x, weight, bias, gamma, beta, stride=stride, c_tile=16, t_tile_max=128)
    out = jax.block_until_ready(out)

    ref = _reference(x, weight, bias, gamma, beta, stride=stride)
    assert out.shape == (B, C_out, (T - K) // stride + 1)
    assert jnp.max(jnp.abs(out - ref)) < 1e-4, "mismatch vs reference"

    print("KERNEL_OK")
</pallas_src>

<mosaic_0001>
module attributes {stable_mosaic.version = 11 : i64} {
  func.func @_conv_gn_gelu_kernel(%arg0: i32, %arg1: i32, %arg2: i32, %arg3: memref<1x10x256xf32, #tpu.memory_space<vmem>>, %arg4: memref<16x10xf32, #tpu.memory_space<vmem>>, %arg5: memref<16x1xf32, #tpu.memory_space<vmem>>, %arg6: memref<16x1xf32, #tpu.memory_space<vmem>>, %arg7: memref<1x16x128xf32, #tpu.memory_space<vmem>>, %arg8: memref<16x1xf32, #tpu.memory_space<vmem>>, %arg9: memref<16x1xf32, #tpu.memory_space<vmem>>) attributes {dimension_semantics = [#tpu.dimension_semantics<parallel>, #tpu.dimension_semantics<parallel>, #tpu.dimension_semantics<arbitrary>], iteration_bounds = array<i64: 2, 2, 4>, scalar_prefetch = 0 : i64, scratch_operands = 2 : i64, tpu.core_type = #tpu.core_type<tc>, window_params = [{transform_indices = @transform_0, window_bounds = array<i64: 1, 10, 256>}, {transform_indices = @transform_1, window_bounds = array<i64: 16, 10>}, {transform_indices = @transform_2, window_bounds = array<i64: 16, 1>}, {transform_indices = @transform_3, window_bounds = array<i64: 16, 1>}, {transform_indices = @transform_4, window_bounds = array<i64: 1, 16, 128>}]} {
    %c0_i32 = arith.constant 0 : i32
    %0 = arith.cmpi eq, %arg2, %c0_i32 : i32
    %1 = arith.extui %0 : i1 to i32
    %c0_i32_0 = arith.constant 0 : i32
    %2 = arith.cmpi ne, %1, %c0_i32_0 : i32
    scf.if %2 {
      %cst_11 = arith.constant 0.000000e+00 : f32
      %22 = vector.broadcast %cst_11 : f32 to vector<16x1xf32>
      %c0_12 = arith.constant 0 : index
      %c0_13 = arith.constant 0 : index
      %23 = vector.load %arg8[%c0_12, %c0_13] : memref<16x1xf32, #tpu.memory_space<vmem>>, vector<16x1xf32>
      tpu.vector_store %arg8[%c0_12, %c0_13], %22 {strides = array<i32>} : memref<16x1xf32, #tpu.memory_space<vmem>>, vector<16x1xf32>,
      %cst_14 = arith.constant 0.000000e+00 : f32
      %24 = vector.broadcast %cst_14 : f32 to vector<16x1xf32>
      %c0_15 = arith.constant 0 : index
      %c0_16 = arith.constant 0 : index
      %25 = vector.load %arg9[%c0_15, %c0_16] : memref<16x1xf32, #tpu.memory_space<vmem>>, vector<16x1xf32>
      tpu.vector_store %arg9[%c0_15, %c0_16], %24 {strides = array<i32>} : memref<16x1xf32, #tpu.memory_space<vmem>>, vector<16x1xf32>,
    } else {
    }
    %c2_i32 = arith.constant 2 : i32
    %3 = arith.cmpi slt, %arg2, %c2_i32 : i32
    %c2_i32_1 = arith.constant 2 : i32
    %4 = arith.subi %arg2, %c2_i32_1 : i32
    %5 = arith.select %3, %arg2, %4 : i32
    %c128_i32 = arith.constant 128 : i32
    %6 = arith.muli %5, %c128_i32 : i32
    %7 = tpu.assume_multiple %6, 128 : i32
    %c0 = arith.constant 0 : index
    %c0_2 = arith.constant 0 : index
    %8 = arith.index_cast %7 : i32 to index
    %9 = vector.load %arg3[%c0, %c0_2, %8] : memref<1x10x256xf32, #tpu.memory_space<vmem>>, vector<1x10x128xf32>
    %10 = vector.shape_cast %9 : vector<1x10x128xf32> to vector<10x128xf32>
    %c0_3 = arith.constant 0 : index
    %c0_4 = arith.constant 0 : index
    %11 = vector.load %arg4[%c0_3, %c0_4] : memref<16x10xf32, #tpu.memory_space<vmem>>, vector<16x10xf32>
    %cst = arith.constant dense<0.000000e+00> : vector<16x128xf32>
    %12 = tpu.matmul %11, %10, %cst {dimension_numbers = #tpu.dot_dimension_numbers<[1], [0], [0], [1], [0, 0, 1, 1], [], []>} : vector<16x10xf32>, vector<10x128xf32>, vector<16x128xf32> -> vector<16x128xf32>
    %c2_i32_5 = arith.constant 2 : i32
    %13 = arith.cmpi slt, %arg2, %c2_i32_5 : i32
    %14 = arith.extui %13 : i1 to i32
    %c0_i32_6 = arith.constant 0 : i32
    %15 = arith.cmpi ne, %14, %c0_i32_6 : i32
    scf.if %15 {
      %c0_11 = arith.constant 0 : index
      %c0_12 = arith.constant 0 : index
      %22 = vector.load %arg8[%c0_11, %c0_12] : memref<16x1xf32, #tpu.memory_space<vmem>>, vector<16x1xf32>
      %cst_13 = arith.constant dense<0.000000e+00> : vector<16xf32>
      %23 = vector.multi_reduction <add>, %12, %cst_13 [1] : vector<16x128xf32> to vector<16xf32>
      %24 = vector.shape_cast %23 : vector<16xf32> to vector<16x1xf32>
      %25 = arith.addf %22, %24 : vector<16x1xf32>
      %c0_14 = arith.constant 0 : index
      %c0_15 = arith.constant 0 : index
      %26 = vector.load %arg8[%c0_14, %c0_15] : memref<16x1xf32, #tpu.memory_space<vmem>>, vector<16x1xf32>
      tpu.vector_store %arg8[%c0_14, %c0_15], %25 {strides = array<i32>} : memref<16x1xf32, #tpu.memory_space<vmem>>, vector<16x1xf32>,
      %c0_16 = arith.constant 0 : index
      %c0_17 = arith.constant 0 : index
      %27 = vector.load %arg9[%c0_16, %c0_17] : memref<16x1xf32, #tpu.memory_space<vmem>>, vector<16x1xf32>
      %28 = arith.mulf %12, %12 : vector<16x128xf32>
      %cst_18 = arith.constant dense<0.000000e+00> : vector<16xf32>
      %29 = vector.multi_reduction <add>, %28, %cst_18 [1] : vector<16x128xf32> to vector<16xf32>
      %30 = vector.shape_cast %29 : vector<16xf32> to vector<16x1xf32>
      %31 = arith.addf %27, %30 : vector<16x1xf32>
      %c0_19 = arith.constant 0 : index
      %c0_20 = arith.constant 0 : index
      %32 = vector.load %arg9[%c0_19, %c0_20] : memref<16x1xf32, #tpu.memory_space<vmem>>, vector<16x1xf32>
      tpu.vector_store %arg9[%c0_19, %c0_20], %31 {strides = array<i32>} : memref<16x1xf32, #tpu.memory_space<vmem>>, vector<16x1xf32>,
    } else {
    }
    %c2_i32_7 = arith.constant 2 : i32
    %16 = arith.cmpi eq, %arg2, %c2_i32_7 : i32
    %17 = arith.extui %16 : i1 to i32
    %c0_i32_8 = arith.constant 0 : i32
    %18 = arith.cmpi ne, %17, %c0_i32_8 : i32
    scf.if %18 {
      %c0_11 = arith.constant 0 : index
      %c0_12 = arith.constant 0 : index
      %22 = vector.load %arg8[%c0_11, %c0_12] : memref<16x1xf32, #tpu.memory_space<vmem>>, vector<16x1xf32>
      %cst_13 = arith.constant 5.000000e-03 : f32
      %23 = vector.broadcast %cst_13 : f32 to vector<16x1xf32>
      %24 = arith.mulf %22, %23 : vector<16x1xf32>
      %c0_14 = arith.constant 0 : index
      %c0_15 = arith.constant 0 : index
      %25 = vector.load %arg9[%c0_14, %c0_15] : memref<16x1xf32, #tpu.memory_space<vmem>>, vector<16x1xf32>
      %cst_16 = arith.constant 5.000000e-03 : f32
      %26 = vector.broadcast %cst_16 : f32 to vector<16x1xf32>
      %27 = arith.mulf %25, %26 : vector<16x1xf32>
      %28 = arith.mulf %24, %24 : vector<16x1xf32>
      %29 = arith.subf %27, %28 : vector<16x1xf32>
      %c0_17 = arith.constant 0 : index
      %c0_18 = arith.constant 0 : index
      %30 = vector.load %arg5[%c0_17, %c0_18] : memref<16x1xf32, #tpu.memory_space<vmem>>, vector<16x1xf32>
      %cst_19 = arith.constant 9.99999974E-6 : f32
      %31 = vector.broadcast %cst_19 : f32 to vector<16x1xf32>
      %32 = arith.addf %29, %31 : vector<16x1xf32>
      %33 = math.rsqrt %32 : vector<16x1xf32>
      %34 = arith.mulf %30, %33 : vector<16x1xf32>
      %c0_20 = arith.constant 0 : index
      %c0_21 = arith.constant 0 : index
      %35 = vector.load %arg6[%c0_20, %c0_21] : memref<16x1xf32, #tpu.memory_space<vmem>>, vector<16x1xf32>
      %36 = arith.mulf %24, %34 : vector<16x1xf32>
      %37 = arith.subf %35, %36 : vector<16x1xf32>
      %c0_22 = arith.constant 0 : index
      %c0_23 = arith.constant 0 : index
      %38 = vector.load %arg8[%c0_22, %c0_23] : memref<16x1xf32, #tpu.memory_space<vmem>>, vector<16x1xf32>
      tpu.vector_store %arg8[%c0_22, %c0_23], %34 {strides = array<i32>} : memref<16x1xf32, #tpu.memory_space<vmem>>, vector<16x1xf32>,
      %c0_24 = arith.constant 0 : index
      %c0_25 = arith.constant 0 : index
      %39 = vector.load %arg9[%c0_24, %c0_25] : memref<16x1xf32, #tpu.memory_space<vmem>>, vector<16x1xf32>
      tpu.vector_store %arg9[%c0_24, %c0_25], %37 {strides = array<i32>} : memref<16x1xf32, #tpu.memory_space<vmem>>, vector<16x1xf32>,
    } else {
    }
    %c2_i32_9 = arith.constant 2 : i32
    %19 = arith.cmpi sge, %arg2, %c2_i32_9 : i32
    %20 = arith.extui %19 : i1 to i32
    %c0_i32_10 = arith.constant 0 : i32
    %21 = arith.cmpi ne, %20, %c0_i32_10 : i32
    scf.if %21 {
      %c0_11 = arith.constant 0 : index
      %c0_12 = arith.constant 0 : index
      %22 = vector.load %arg8[%c0_11, %c0_12] : memref<16x1xf32, #tpu.memory_space<vmem>>, vector<16x1xf32>
      %23 = vector.broadcast %22 : vector<16x1xf32> to vector<16x128xf32>
      %24 = arith.mulf %12, %23 : vector<16x128xf32>
      %c0_13 = arith.constant 0 : index
      %c0_14 = arith.constant 0 : index
      %25 = vector.load %arg9[%c0_13, %c0_14] : memref<16x1xf32, #tpu.memory_space<vmem>>, vector<16x1xf32>
      %26 = vector.broadcast %25 : vector<16x1xf32> to vector<16x128xf32>
      %27 = arith.addf %24, %26 : vector<16x128xf32>
      %cst_15 = arith.constant 5.000000e-01 : f32
      %28 = vector.broadcast %cst_15 : f32 to vector<16x128xf32>
      %29 = arith.mulf %28, %27 : vector<16x128xf32>
      %cst_16 = arith.constant 0.707106769 : f32
      %30 = vector.broadcast %cst_16 : f32 to vector<16x128xf32>
      %31 = arith.mulf %27, %30 : vector<16x128xf32>
      %32 = math.erf %31 : vector<16x128xf32>
      %cst_17 = arith.constant 1.000000e+00 : f32
      %33 = vector.broadcast %cst_17 : f32 to vector<16x128xf32>
      %34 = arith.addf %33, %32 : vector<16x128xf32>
      %35 = arith.mulf %29, %34 : vector<16x128xf32>
      %c0_18 = arith.constant 0 : index
      %c0_19 = arith.constant 0 : index
      %c0_20 = arith.constant 0 : index
      %36 = vector.load %arg7[%c0_18, %c0_19, %c0_20] : memref<1x16x128xf32, #tpu.memory_space<vmem>>, vector<1x16x128xf32>
      %37 = vector.shape_cast %36 : vector<1x16x128xf32> to vector<16x128xf32>
      %38 = vector.shape_cast %35 : vector<16x128xf32> to vector<1x16x128xf32>
      tpu.vector_store %arg7[%c0_18, %c0_19, %c0_20], %38 {strides = array<i32>} : memref<1x16x128xf32, #tpu.memory_space<vmem>>, vector<1x16x128xf32>,
    } else {
    }
    return
  }
  func.func @transform_0(%arg0: i32, %arg1: i32, %arg2: i32) -> (i32, i32, i32) {
    %c0_i32 = arith.constant 0 : i32
    %c0_i32_0 = arith.constant 0 : i32
    %c0_i32_1 = arith.constant 0 : i32
    return %arg0, %c0_i32, %c0_i32_0 : i32, i32, i32
  }
  func.func @transform_1(%arg0: i32, %arg1: i32, %arg2: i32) -> (i32, i32) {
    %c0_i32 = arith.constant 0 : i32
    %c0_i32_0 = arith.constant 0 : i32
    return %arg1, %c0_i32 : i32, i32
  }
  func.func @transform_2(%arg0: i32, %arg1: i32, %arg2: i32) -> (i32, i32) {
    %c0_i32 = arith.constant 0 : i32
    %c0_i32_0 = arith.constant 0 : i32
    return %arg1, %c0_i32 : i32, i32
  }
  func.func @transform_3(%arg0: i32, %arg1: i32, %arg2: i32) -> (i32, i32) {
    %c0_i32 = arith.constant 0 : i32
    %c0_i32_0 = arith.constant 0 : i32
    return %arg1, %c0_i32 : i32, i32
  }
  func.func @transform_4(%arg0: i32, %arg1: i32, %arg2: i32) -> (i32, i32, i32) {
    %c2_i32 = arith.constant 2 : i32
    %0 = arith.cmpi slt, %arg2, %c2_i32 : i32
    %c2_i32_0 = arith.constant 2 : i32
    %1 = arith.subi %arg2, %c2_i32_0 : i32
    %c0_i32 = arith.constant 0 : i32
    %2 = arith.select %0, %c0_i32, %1 : i32
    %c0_i32_1 = arith.constant 0 : i32
    return %arg0, %arg1, %2 : i32, i32, i32
  }
}

</mosaic_0001>

<bundles_post_ra>
// kernel: tpu_custom_call.1
= control target key start
LH: loop header
LB: loop body
LE: loop exit
PB: predicated region body
PF: predicated region fallthrough
CT: control target
= control target key end

     0   :  { %9 = vsyncpa [#allocation5], 0  ;;  %s1191_s0 = inlined_call_operand.vmem [shape: f32[2,10,256], index: 0, kind: input, shape index: {}]   ;;  %s1192_s1 = inlined_call_operand.vmem [shape: f32[32,10], index: 1, kind: input, shape index: {}]   ;;  %s1193_s2 = inlined_call_operand.vmem [shape: f32[32,1], index: 2, kind: input, shape index: {}]   ;;  %s1194_s3 = inlined_call_operand.vmem [shape: f32[32,1], index: 3, kind: input, shape index: {}]   ;;  %s1195_s4 = inlined_call_operand.hbm [shape: f32[2,32,200], index: 4, kind: output, shape index: {}]  }
   0x1   :  { %11 = vsyncpa [#allocation5 + $0x1], 0  ;;  %s979_s15 = smov 0   ;;  %s981_s16 = smov 0  }
   0x2   :  { %s983_s17 = smov 0   ;;  %s985_s18 = smov 0  }
   0x3   :  { %s987_s19 = smov 0   ;;  %s989_s20 = smov 0  }
   0x4   :  { %s991_s21 = smov 0   ;;  %s993_s22 = smov 0  }
   0x5   :  { %s995_s23 = smov 0   ;;  %s997_s24 = smov 0  }
   0x6 LB: > { %1203 = sst [smem:[#allocation7_spill]] %s935_s21  ;;  %s695_s25 = sadd.s32 4294967295, %s947_s24   ;;  %s947_s24 = sphi %s997_s24, %s17_s24   ;;  %s943_s23 = sphi %s995_s23, %s1219_s23   ;;  %s939_s22 = sphi %s993_s22, %s1218_s22   ;;  %s935_s21 = sphi %s991_s21, %s1217_s21   ;;  %s931_s20 = sphi %s989_s20, %s1216_s20   ;;  %s927_s19 = sphi %s987_s19, %s1215_s19   ;;  %s923_s18 = sphi %s985_s18, %s1214_s18   ;;  %s919_s17 = sphi %s983_s17, %s1222_s17   ;;  %s915_s16 = sphi %s981_s16, %s1221_s16   ;;  %s911_s15 = sphi %s979_s15, %s1220_s15  }
   0x7   : > { %1204 = sst [smem:[#allocation8_spill]] %s939_s22  ;;  %s696_s26 = sadd.s32 4294967294, %s947_s24  }
   0x8   : > { %1205 = sst [smem:[#allocation9_spill]] %s943_s23  ;;  %s29_s27 = sadd.s32 1, %s935_s21 }
   0x9   : > { %s32_s28 = sadd.s32 1, %s939_s22  ;;  %p30_p0 = scmp.ge.s32.totalorder %s29_s27, 4 }
   0xa   : > { %s36_s29 = sadd.s32 1, %s943_s23  ;;  %p144_p1 = scmp.lt.s32.totalorder %s935_s21, 2 }
   0xb   : > { %s697_s30 = sadd.s32 4294967294, %s935_s21  ;;  %s1224_s27 = smov (%p30_p0, %s29_s27), 0 }
   0xc   : > { %1206 = sst [smem:[#allocation10_spill]] %s1224_s27  ;;  %s1226_s28 = smov (!%p30_p0, %s32_s28), %s939_s22 }
   0xd   : > { %s1228_s30 = smov (%p144_p1, %s697_s30), 0  ;;  %p34_p2 = scmp.ge.s32.totalorder %s1226_s28, 2 }
   0xe   : > { %p147_p3 = scmp.lt.s32.totalorder %s1224_s27, 2  ;;  %s698_s5 = sadd.s32 4294967294, %s1224_s27 }
   0xf   : > { %s157_s6 = sadd.s32 1, %s919_s17  ;;  %s1230_s28 = smov (%p34_p2, %s1226_s28), 0 }
  0x10   : > { %1207 = sst [smem:[#allocation11_spill]] %s1230_s28  ;;  %s1232_s29 = smov (!%p34_p2, %s36_s29), %s943_s23 }
  0x11   : > { %s1234_s5 = smov (%p147_p3, %s698_s5), 0  ;;  %p38_p4 = scmp.ge.s32.totalorder %s1232_s29, 2 }
  0x12   : > { %s151_s7 = ssub.s32 %s939_s22, %s1230_s28  ;;  %s153_s8 = ssub.s32 %s1228_s30, %s1234_s5 }
  0x13   : > { %p167_p5 = scmp.ne.s32.totalorder %s919_s17, %s915_s16  ;;  %s1236_s29 = smov (%p38_p4, %s1232_s29), 0 }
  0x14   : > { %1208 = sst [smem:[#allocation12_spill]] %s1236_s29  ;;  %p168_p6 = scmp.eq.s32.totalorder %s695_s25, 15 }
  0x15   : > { %p173_p7 = scmp.ne.s32.totalorder %s915_s16, %s911_s15  ;;  %s150_s9 = ssub.s32 %s943_s23, %s1236_s29 }
  0x16   : > { %p174_p8 = scmp.eq.s32.totalorder %s696_s26, 15  ;;  %s152_s10 = sor.u32 %s151_s7, %s150_s9 }
  0x17   : > { %p1055_p9 = por %p168_p6, %p167_p5  ;;  %s154_s12 = sor.u32 %s153_s8, %s152_s10 }
  0x18   : > { %p1059_p10 = por %p174_p8, %p173_p7  ;;  %p155_p11 = scmp.eq.s32.totalorder %s154_s12, 0 }
  0x19   : > { %p701_p12 = scmp.ge.s32.totalorder %s947_s24, 1  ;;  %p227_p13 = scmp.lt.s32.totalorder %s947_s24, 17 }
  0x1a   : > { %s1066_s14 = scalar_select %p155_p11, %s919_s17, %s157_s6  }
  0x1b   : > { %p228_p0 = pnand %p701_p12, %p227_p13 }
  0x1c   : > { %1211 = sst [smem:[#allocation13_spill]] %s1066_s14  ;;  %s1201_s25 = sand.u32 (!%p228_p0), 1, %s915_s16  }
  0x1d   : > { %231 = sbr.rel (%p228_p0) target bundleno = 561 (0x231), region = 36  ;;  %p268_p1 = scmp.lt.s32.totalorder (!%p228_p0), %s931_s20, 1 }
  0x1e   : > { %s702_s26 = sshll.u32 (!%p228_p0), %s1201_s25, 4  ;;  %s705_s30 = sshll.u32 (!%p228_p0), %s927_s19, 1 }
  0x1f   : > { %p274_p2 = scmp.lt.s32.totalorder (!%p228_p0), %s705_s30, 3  ;;  %p711_p3 = scmp.ne.s32.totalorder (!%p228_p0), %s923_s18, 0 }
  0x22   : > { %s269_s5 = scalar_select %p268_p1, %s931_s20, 1 }
  0x23   : > { %s1238_s30 = smov (!%p274_p2, %s705_s30), 3  ;;  %298 = sbr.rel (%p711_p3) target bundleno = 45 (0x2d), region = 40 }
  0x24   : > { %s731_s7 = sshll.u32 %s269_s5, 5  ;;  %s706_s10 = sshll.u32 %s1238_s30, 3 }
  0x25   : > { %s272_s6 = scalar_lea.vmem %s1191_s0, %s731_s7  ;;  %s277_s28 = scalar_lea.vmem %s1192_s1, %s706_s10 }
  0x26   : > { %s1083_s22 = scalar_lea.vmem %s1193_s2, %s706_s10  ;;  %s1088_s14 = scalar_lea.vmem %s1194_s3, %s706_s10 }
  0x27   : > { %s1090_s5 = scalar_lea.vmem [#allocation4], %s702_s26 }
  0x28   : > { %vm299_vm0 = vcmask 7168   ;;  %v949_v0 = vmov 0.0  }
  0x29   : > { %300 = vst.msk [vmem:[#allocation2] sm:$0xff] %vm299_vm0, %v949_v0 }
  0x2a   : > { %301 = vst.msk [vmem:[#allocation2 + $0x8] sm:$0xff] %vm299_vm0, %v949_v0 }
  0x2b   : > { %302 = vst.msk [vmem:[#allocation3] sm:$0xff] %vm299_vm0, %v949_v0 }
  0x2c   : > { %303 = vst.msk [vmem:[#allocation3 + $0x8] sm:$0xff] %vm299_vm0, %v949_v0 }
  0x2d PF: > { %p304_p4 = scmp.lt.s32.totalorder %s923_s18, 2  ;;  %s712_s21 = sadd.s32 4294967294, %s923_s18  ;;  %vm323_vm1 = vcmask 1041408   ;;  %v314_v3 = vld [vmem:[%s277_s28] sm:$0xff]  ;;  %vm316_vm2 = vcmask 80896   ;;  %v315_v4 = vld [vmem:[%s277_s28 + $0x8] sm:$0xff] }
  0x2e   : > { %p718_p5 = scmp.ge.s32.totalorder %s923_s18, 2 }
  0x2f   : > { %s306_s23 = scalar_select %p304_p4, %s923_s18, %s712_s21 }
  0x31   : > { %s713_s27 = sshll.u32 %s306_s23, 7 }
  0x32   : > { %s308_s29 = sshra.s32 %s713_s27, 7 }
  0x33   : > { %s714_s25 = sshll.u32 %s308_s29, 3 }
  0x34   : > { %s311_s26 = scalar_lea.vmem %s272_s6, %s714_s25 }
  0x35   : > { %v313_v1 = vld [vmem:[%s311_s26 + $0x10] sm:$0x3]  ;;  %v312_v2 = vld [vmem:[%s311_s26] sm:$0xff] }
  0x36   : > { %715 = vmatpush.msk.msra.mxu0 %vm323_vm1, %v313_v1  ;;  %733 = vmatpush.msk.msra.mxu1 %vm323_vm1, %v313_v1 }
  0x38   : > { %342 = vmatpush.msra.mxu0 %v312_v2  ;;  %734 = vmatpush.msra.mxu1 %v312_v2 }
  0x39   : > { %716 = vmatmul.msk.f32.vlgmr.msra.gmra.mxu0 %vm316_vm2, %v314_v3  ;;  %717 = vmatmul.msk.f32.vlgmr.msra.gmra.mxu1 %vm316_vm2, %v315_v4 }
  0xb2   : > { %352 = sbr.rel (%p718_p5) target bundleno = 312 (0x138), region = 44 }
  0xb6   : > { %v1100_v5 = vpop.f32.mrf.mxu0  ;;  %v1102_v6 = vpop.f32.mrf.mxu1 }
  0xb7   : > { %355 = vadd.xlane.f32.xlu0 %v1100_v5  ;;  %v366_v7 = vmul.f32 %v1100_v5, %v1100_v5  ;;  %v367_v8 = vmul.f32 %v1102_v6, %v1102_v6  ;;  %v353_v9 = vld [vmem:[#allocation2] sm:$0xff]  ;;  %vm361_vm3 = vcmask 7168   ;;  %v364_v11 = vld [vmem:[#allocation3] sm:$0xff]  ;;  %v354_v15 = vld [vmem:[#allocation2 + $0x8] sm:$0xff] }
  0xb8   : > { %v365_v17 = vld [vmem:[#allocation3 + $0x8] sm:$0xff] }
  0xb9   : > { %368 = vadd.xlane.f32.xlu1 %v366_v7 }
  0xbf   : > { %357 = vadd.xlane.f32.xlu0 %v1102_v6 }
  0xc1   : > { %370 = vadd.xlane.f32.xlu1 %v367_v8 }
 0x12a   : > { %v356_v10 = vpop.xlane.xlu0 %355 }
 0x12b   : > { %v359_v12 = vadd.f32 %v356_v10, %v353_v9 }
 0x12c   : > { %v369_v13 = vpop.xlane.xlu1 %368 }
 0x12d   : > { %362 = vst.msk [vmem:[#allocation2] sm:$0xff] %vm361_vm3, %v359_v12  ;;  %v372_v14 = vadd.f32 %v369_v13, %v364_v11 }
 0x12f   : > { %374 = vst.msk [vmem:[#allocation3] sm:$0xff] %vm361_vm3, %v372_v14 }
 0x132   : > { %v358_v16 = vpop.xlane.xlu0 %357 }
 0x133   : > { %v360_v18 = vadd.f32 %v358_v16, %v354_v15 }
 0x134   : > { %v371_v19 = vpop.xlane.xlu1 %370 }
 0x135   : > { %363 = vst.msk [vmem:[#allocation2 + $0x8] sm:$0xff] %vm361_vm3, %v360_v18  ;;  %v373_v20 = vadd.f32 %v371_v19, %v365_v17 }
 0x137   : > { %375 = vst.msk [vmem:[#allocation3 + $0x8] sm:$0xff] %vm361_vm3, %v373_v20 }
 0x138 PF: > { %p719_p6 = scmp.ne.s32.totalorder %s923_s18, 2 }
 0x13a   : > { %379 = sbr.rel (%p719_p6) target bundleno = 354 (0x162), region = 48 }
 0x13f   : > { %v380_v21 = vld [vmem:[#allocation2] sm:$0xff]  ;;  %v384_v22 = vld [vmem:[#allocation3] sm:$0xff]  ;;  %v381_v25 = vld [vmem:[#allocation2 + $0x8] sm:$0xff]  ;;  %vm424_vm10 = vcmask 7168  }
 0x140   : > { %v382_v23 = vmul.f32 0.005, %v380_v21  ;;  %v386_v24 = vmul.f32 0.005, %v384_v22  ;;  %v385_v26 = vld [vmem:[#allocation3 + $0x8] sm:$0xff]  ;;  %v392_v45 = vld [vmem:[%s1083_s22] sm:$0xff] }
 0x141   : > { %v383_v27 = vmul.f32 0.005, %v381_v25  ;;  %v387_v28 = vmul.f32 0.005, %v385_v26  ;;  %v393_v47 = vld [vmem:[%s1083_s22 + $0x8] sm:$0xff]  ;;  %v418_v53 = vld [vmem:[%s1088_s14] sm:$0xff] }
 0x142   : > { %v388_v29 = vmul.f32 %v382_v23, %v382_v23  ;;  %v419_v55 = vld [vmem:[%s1088_s14 + $0x8] sm:$0xff] }
 0x143   : > { %v389_v30 = vmul.f32 %v383_v27, %v383_v27 }
 0x144   : > { %v390_v31 = vsub.f32 %v386_v24, %v388_v29 }
 0x145   : > { %v391_v32 = vsub.f32 %v387_v28, %v389_v30 }
 0x146   : > { %v394_v33 = vadd.f32 1e-05, %v390_v31 }
 0x147   : > { %v395_v34 = vadd.f32 1e-05, %v391_v32 }
 0x148   : > { %827 = vrsqrt.f32 %v394_v33  ;;  %vm402_vm4 = vweird.f32 %v394_v33 }
 0x149   : > { %829 = vrsqrt.f32 %v395_v34  ;;  %vm412_vm6 = vweird.f32 %v395_v34 }
 0x14e   : > { %v828_v35 = vpop.eup %827 }
 0x14f   : > { %v830_v36 = vpop.eup %829  ;;  %v397_v37 = vmul.f32 %v828_v35, %v394_v33  ;;  %vm403_vm5 = vweird.f32 %v828_v35 }
 0x150   : > { %v407_v38 = vmul.f32 %v830_v36, %v395_v34  ;;  %vm413_vm7 = vweird.f32 %v830_v36  ;;  %vm404_vm8 = vmor %vm402_vm4, %vm403_vm5 }
 0x151   : > { %v398_v39 = vmul.f32 %v828_v35, %v397_v37  ;;  %vm414_vm9 = vmor %vm412_vm6, %vm413_vm7 }
 0x152   : > { %v408_v40 = vmul.f32 %v830_v36, %v407_v38 }
 0x153   : > { %v399_v41 = vmul.f32 0.5, %v398_v39 }
 0x154   : > { %v409_v42 = vmul.f32 0.5, %v408_v40 }
 0x155   : > { %v400_v43 = vsub.f32 1.5, %v399_v41 }
 0x156   : > { %v410_v44 = vsub.f32 1.5, %v409_v42 }
 0x157   : > { %v401_v46 = vmul.f32 %v828_v35, %v400_v43 }
 0x158   : > { %v411_v48 = vmul.f32 %v830_v36, %v410_v44 }
 0x159   : > { %v405_v49 = vsel %vm404_vm8, %v828_v35, %v401_v46 }
 0x15a   : > { %v416_v50 = vmul.f32 %v405_v49, %v392_v45  ;;  %v415_v51 = vsel %vm414_vm9, %v830_v36, %v411_v48 }
 0x15b   : > { %v417_v52 = vmul.f32 %v415_v51, %v393_v47 }
 0x15c   : > { %v420_v54 = vmul.f32 %v416_v50, %v382_v23  ;;  %425 = vst.msk [vmem:[#allocation2] sm:$0xff] %vm424_vm10, %v416_v50 }
 0x15d   : > { %v421_v56 = vmul.f32 %v417_v52, %v383_v27  ;;  %426 = vst.msk [vmem:[#allocation2 + $0x8] sm:$0xff] %vm424_vm10, %v417_v52 }
 0x15e   : > { %v422_v57 = vsub.f32 %v418_v53, %v420_v54 }
 0x15f   : > { %v423_v58 = vsub.f32 %v419_v55, %v421_v56 }
 0x160   : > { %427 = vst.msk [vmem:[#allocation3] sm:$0xff] %vm424_vm10, %v422_v57 }
 0x161   : > { %428 = vst.msk [vmem:[#allocation3 + $0x8] sm:$0xff] %vm424_vm10, %v423_v58 }
 0x162 PF: > { %432 = sbr.rel (%p304_p4) target bundleno = 540 (0x21c), region = 52 }
 0x167   : > { %v447_v59 = vld [vmem:[#allocation3] sm:$0xff]  ;;  %v433_v60 = vld [vmem:[#allocation2] sm:$0xff]  ;;  %v950_v61 = vmov 0   ;;  %v434_v63 = vld [vmem:[#allocation2 + $0x8] sm:$0xff] }
 0x168   : > { %832 = vset.pattern.permute.xlu1 %v950_v61  ;;  %831 = vset.pattern.permute.xlu0 %v950_v61  ;;  %v448_v62 = vld [vmem:[#allocation3 + $0x8] sm:$0xff] }
 0x169   : > { %451 = vperm.xlu1 %832, %v447_v59   ;;  %437 = vperm.xlu0 %831, %v433_v60  }
 0x171   : > { %456 = vperm.xlu1 %832, %v448_v62   ;;  %442 = vperm.xlu0 %831, %v434_v63  }
 0x1db   : > { %v452_v0 = vpop.permute.xlu1 %451  ;;  %v438_v1 = vpop.permute.xlu0 %437 }
 0x1dc   : > { %v445_v2 = vmul.f32 %v438_v1, %v1100_v5 }
 0x1de   : > { %v1119_v3 = vadd.f32 %v452_v0, %v445_v2 }
 0x1e0   : > { %v463_v4 = vmul.f32 0.70710677, %v1119_v3 }
 0x1e2   : > { %v465_v7 = vmul.f32 %v463_v4, %v463_v4 }
 0x1e3   : > { %v443_v8 = vpop.permute.xlu0 %442  ;;  %v457_v11 = vpop.permute.xlu1 %456 }
 0x1e4   : > { %v466_v9 = vmin.f32 %v465_v7, 16.0  ;;  %v446_v10 = vmul.f32 %v443_v8, %v1102_v6 }
 0x1e6   : > { %v467_v12 = vmul.f32 2.1237322e-06, %v466_v9  ;;  %v478_v13 = vmul.f32 3.8918573e-05, %v466_v9  ;;  %v1123_v14 = vadd.f32 %v457_v11, %v446_v10 }
 0x1e8   : > { %v468_v15 = vadd.f32 0.00028619796, %v467_v12  ;;  %v479_v16 = vadd.f32 0.001143296, %v478_v13  ;;  %v1126_v17 = vmul.f32 0.70710677, %v1123_v14 }
 0x1e9   : > { %v461_v13 = vmul.f32 0.5, %v1119_v3 }
 0x1ea   : > { %v469_v5 = vmul.f32 %v468_v15, %v466_v9  ;;  %v480_v18 = vmul.f32 %v479_v16, %v466_v9  ;;  %v505_v19 = vmul.f32 %v1126_v17, %v1126_v17 }
 0x1ec   : > { %v481_v20 = vadd.f32 0.014752088, %v480_v18  ;;  %v470_v21 = vadd.f32 0.0036580483, %v469_v5  ;;  %v506_v22 = vmin.f32 %v505_v19, 16.0 }
 0x1ee   : > { %v482_v23 = vmul.f32 %v481_v20, %v466_v9  ;;  %v507_v6 = vmul.f32 2.1237322e-06, %v506_v22  ;;  %v518_v24 = vmul.f32 3.8918573e-05, %v506_v22  ;;  %v471_v26 = vmul.f32 %v470_v21, %v466_v9 }
 0x1f0   : > { %v483_v25 = vadd.f32 0.112945676, %v482_v23  ;;  %v508_v27 = vadd.f32 0.00028619796, %v507_v6  ;;  %v519_v28 = vadd.f32 0.001143296, %v518_v24 }
 0x1f1   : > { %v472_v33 = vadd.f32 0.05243302, %v471_v26  ;;  %v462_v23 = vmul.f32 0.5, %v1123_v14 }
 0x1f2   : > { %v484_v29 = vmul.f32 %v483_v25, %v466_v9  ;;  %v509_v30 = vmul.f32 %v508_v27, %v506_v22  ;;  %v520_v31 = vmul.f32 %v519_v28, %v506_v22 }
 0x1f3   : > { %v473_v39 = vmul.f32 %v472_v33, %v466_v9 }
 0x1f4   : > { %v485_v32 = vadd.f32 0.4994258, %v484_v29  ;;  %v521_v34 = vadd.f32 0.014752088, %v520_v31  ;;  %v510_v36 = vadd.f32 0.0036580483, %v509_v30 }
 0x1f5   : > { %v474_v43 = vadd.f32 0.18741608, %v473_v39 }
 0x1f6   : > { %v486_v35 = vmul.f32 %v485_v32, %v466_v9  ;;  %v522_v37 = vmul.f32 %v521_v34, %v506_v22  ;;  %v511_v41 = vmul.f32 %v510_v36, %v506_v22 }
 0x1f7   : > { %v475_v48 = vmul.f32 %v474_v43, %v466_v9 }
 0x1f8   : > { %v487_v38 = vadd.f32 1.0, %v486_v35  ;;  %v523_v40 = vadd.f32 0.112945676, %v522_v37  ;;  %v512_v45 = vadd.f32 0.05243302, %v511_v41 }
 0x1f9   : > { %v476_v54 = vadd.f32 1.1283791, %v475_v48 }
 0x1fa   : > { %833 = vrcp.f32 %v487_v38  ;;  %v524_v42 = vmul.f32 %v523_v40, %v506_v22  ;;  %v513_v51 = vmul.f32 %v512_v45, %v506_v22  ;;  %v499_v53 = vand.u32 2147483648, %v487_v38 }
 0x1fb   : > { %v497_v56 = vand.u32 2147483647, %v487_v38  ;;  %vm493_vm12 = vweird.f32 %v487_v38  ;;  %v477_v61 = vmul.f32 %v476_v54, %v463_v4 }
 0x1fc   : > { %v525_v44 = vadd.f32 0.4994258, %v524_v42  ;;  %v514_v57 = vadd.f32 0.18741608, %v513_v51  ;;  %v500_v59 = vor.u32 1.1754944e-38, %v499_v53 }
 0x1fd   : > { %vm498_vm14 = vcmp.eq.f32.partialorder %v497_v56, 8.507059e+37 }
 0x1fe   : > { %v526_v46 = vmul.f32 %v525_v44, %v506_v22  ;;  %v515_v0 = vmul.f32 %v514_v57, %v506_v22 }
 0x200   : > { %v834_v47 = vpop.eup %833  ;;  %v527_v50 = vadd.f32 1.0, %v526_v46  ;;  %v516_v10 = vadd.f32 1.1283791, %v515_v0 }
 0x201   : > { %v489_v49 = vmul.f32 %v834_v47, %v487_v38  ;;  %vm494_vm11 = vweird.f32 %v834_v47 }
 0x202   : > { %835 = vrcp.f32 %v527_v50  ;;  %vm495_vm13 = vmor %vm493_vm12, %vm494_vm11  ;;  %v539_v9 = vand.u32 2147483648, %v527_v50  ;;  %v537_v12 = vand.u32 2147483647, %v527_v50  ;;  %vm533_vm0 = vweird.f32 %v527_v50 }
 0x203   : > { %v490_v52 = vsub.f32 1.0, %v489_v49  ;;  %v517_v18 = vmul.f32 %v516_v10, %v1126_v17 }
 0x204   : > { %v540_v5 = vor.u32 1.1754944e-38, %v539_v9  ;;  %vm538_vm2 = vcmp.eq.f32.partialorder %v537_v12, 8.507059e+37 }
 0x205   : > { %v491_v55 = vmul.f32 %v834_v47, %v490_v52 }
 0x207   : > { %v492_v58 = vadd.f32 %v834_v47, %v491_v55 }
 0x208   : > { %v836_v60 = vpop.eup %835 }
 0x209   : > { %v496_v62 = vsel %vm495_vm13, %v834_v47, %v492_v58  ;;  %v529_v1 = vmul.f32 %v836_v60, %v527_v50  ;;  %vm534_vm15 = vweird.f32 %v836_v60 }
 0x20a   : > { %v501_v63 = vsel %vm498_vm14, %v500_v59, %v496_v62  ;;  %vm535_vm1 = vmor %vm533_vm0, %vm534_vm15 }
 0x20b   : > { %v502_v2 = vmul.f32 %v501_v63, %v477_v61  ;;  %v530_v7 = vsub.f32 1.0, %v529_v1 }
 0x20d   : > { %v721_v8 = vclamps-f32 %v502_v2, 1.0  ;;  %v531_v11 = vmul.f32 %v836_v60, %v530_v7 }
 0x20f   : > { %v545_v15 = vadd.f32 1.0, %v721_v8  ;;  %v532_v16 = vadd.f32 %v836_v60, %v531_v11 }
 0x211   : > { %v547_v4 = vmul.f32 %v545_v15, %v461_v13  ;;  %v536_v19 = vsel %vm535_vm1, %v836_v60, %v532_v16 }
 0x212   : > { %v541_v20 = vsel %vm538_vm2, %v540_v5, %v536_v19 }
 0x213   : > { %549 = vst [vmem:[%s1090_s5] sm:$0xff] %v547_v4  ;;  %v542_v21 = vmul.f32 %v541_v20, %v517_v18 }
 0x215   : > { %v722_v22 = vclamps-f32 %v542_v21, 1.0 }
 0x217   : > { %v546_v6 = vadd.f32 1.0, %v722_v22 }
 0x219   : > { %v548_v24 = vmul.f32 %v546_v6, %v462_v23 }
 0x21b   : > { %550 = vst [vmem:[%s1090_s5 + $0x8] sm:$0xff] %v548_v24 }
 0x21c PF: > { %s732_s22 = sshll.u32 %s927_s19, 2  ;;  %s1240_s21 = smov (%p304_p4, %s712_s21), 0 }
 0x21d   : > { %s727_s28 = sshll.u32 %s931_s20, 3  ;;  %s571_s14 = sshll.u32 %s1090_s5, 4  ;;  %s572_s14 = int_to_ptr.vmem [resolvable:$true] %s571_s14 }
 0x21e   : > { %s566_s30 = sadd.s32 %s732_s22, %s1240_s21  ;;  %s1212_s23 = sand.u32 1, %s915_s16  }
 0x21f   : > { %s568_s7 = sadd.s32 %s727_s28, %s566_s30  ;;  %s552_s27 = scalar_lea.sflag [#allocation5], %s1212_s23 }
 0x220   : > { %s728_s8 = sshll.u32 %s568_s7, 3  ;;  %s857_s5 = scalar_lea.hbm %s1195_s4, 128 }
 0x221   : > { %s570_s10 = scalar_lea.hbm %s1195_s4, %s728_s8 }
 0x222   : > { %s573_s12 = sshll.u32 %s570_s10, 4  ;;  %s574_s12 = int_to_ptr.hbm [resolvable:$true] %s573_s12 }
 0x223   : > { %s851_s29 = sshra.s32 %s574_s12, 4  ;;  %s852_s29 = int_to_ptr.hbm [resolvable:$true] %s851_s29 }
 0x224   : > { %s853_s19 = scalar_lea.hbm %s852_s29, 16  ;;  %p858_p12 = scmp.lt.s32.totalorder %s852_s29, %s1195_s4 }
 0x225   : > { %p854_p7 = scmp.ne.s32.totalorder %s852_s29, %s853_s19  ;;  %p859_p13 = scmp.lt.s32.totalorder %s857_s5, %s853_s19 }
 0x227   : > { %p855_p8 = pnand %p854_p7, %p1055_p9  ;;  %p860_p0 = por %p859_p13, %p858_p12 }
 0x229   : > { %p856_p11 = pneg %p855_p8 }
 0x22b   : > { %p861_p1 = pnand %p860_p0, %p856_p11 }
 0x22d   : > { %864 = shalt.err (!%p861_p1)
}
 0x22e   : > { %s951_s26 = smov 128   ;;  %s952_s22 = smov 256  }
 0x22f   : > { %s953_s28 = smov 8  }
 0x230   : > { %735 = dma.vmem_to_hbm [thread:$0]  (%p1055_p9), %s572_s14, 256, %s574_s12, %s552_s27, %s951_s26, %s952_s22, %s953_s28  }
 0x231 PF: > { %p741_p2 = scmp.ge.s32.totalorder %s947_s24, 2  ;;  %s588_s30 = sand.u32 1, %s911_s15  }
 0x232   : > { %s589_s7 = scalar_lea.sflag [#allocation5], %s588_s30 }
 0x233   : > { %p738_p3 = pnand %p741_p2, %p1059_p10 }
 0x235   : > { %p739_p4 = pneg %p738_p3 }
 0x237   : > { %906 = dma.done.wait (%p739_p4), %s589_s7, 256  }
 0x238   : > { %908 = vsyncadd (%p739_p4), %s589_s7, 4294967040  ;;  %s17_s24 = sadd.s32 1, %s947_s24   ;;  %s1213_s8 = sld [smem:[#allocation13_spill]] }
 0x239   : > { %p14_p5 = scmp.ge.s32.totalorder %s17_s24, 18   ;;  %s1214_s18 = sld [smem:[#allocation7_spill]] }
 0x23a   : > { %s1215_s19 = sld [smem:[#allocation8_spill]]  ;;  %s1220_s15 = smov %s915_s16 }
 0x23b   : > { %s1216_s20 = sld [smem:[#allocation9_spill]]  ;;  %s1221_s16 = smov %s919_s17 }
 0x23c   : > { %s1217_s21 = sld [smem:[#allocation10_spill]]  ;;  %16 = sbr.rel (!%p14_p5) target bundleno = 6 (0x6), region = 97 }
 0x23d   : > { %s1218_s22 = sld [smem:[#allocation11_spill]] }
 0x23e   : > { %s1219_s23 = sld [smem:[#allocation12_spill]]  ;;  %s1222_s17 = smov %s1213_s8 }
 0x241   :  { %595 = vsyncpa [#allocation5], 1 }
 0x242   :  { %597 = vsyncpa [#allocation5 + $0x1], 1 }

</bundles_post_ra>
